<compile_context>
chip_gen: v6e
topology: v6e:2x2x1
jax: 0.10.0
libtpu: 0.0.40
codegen_flags: <defaults>
</compile_context>

<pallas_src>
import jax
import jax.numpy as jnp
from jax.experimental import pallas as pl
from jax.experimental.pallas import tpu as pltpu

EPS = 1e-5
NEG_SLOPE = 0.2
KH = KW = 4
STRIDE = 2
PAD = 1
LANE = 128


def _round_up(x, m):
    return ((x + m - 1) // m) * m


def _conv_stats_kernel(p_ref, w_ref, conv_ref, stats_ref):
    """Pass 1: conv tile (MXU, bf16 in / f32 acc) + streaming BN statistics."""
    i = pl.program_id(0)

    conv = jnp.dot(p_ref[...], w_ref[...], preferred_element_type=jnp.float32)
    conv_ref[...] = conv

    # stats block index is constant along the grid -> VMEM-resident accumulator.
    @pl.when(i == 0)
    def _():
        stats_ref[...] = jnp.zeros_like(stats_ref)

    stats_ref[0:1, :] = stats_ref[0:1, :] + jnp.sum(conv, axis=0, keepdims=True)
    stats_ref[1:2, :] = stats_ref[1:2, :] + jnp.sum(conv * conv, axis=0,
                                                    keepdims=True)


def _bn_lrelu_kernel(conv_ref, scale_ref, shift_ref, o_ref):
    """Pass 2: y = conv * scale + shift (BN affine folded), LeakyReLU(0.2)."""
    y = conv_ref[...] * scale_ref[...] + shift_ref[...]
    o_ref[...] = jnp.where(y >= 0, y, NEG_SLOPE * y)


def downsample_block(x, weight, gamma, beta, *, block_m=1024):
    """x: (N, C_in, H, W) f32 NCHW; weight: (C_out, C_in, 4, 4); returns NCHW."""
    N, C_in, H, W = x.shape
    C_out = weight.shape[0]
    H_out = (H + 2 * PAD - KH) // STRIDE + 1
    W_out = (W + 2 * PAD - KW) // STRIDE + 1

    M = N * H_out * W_out
    K = C_in * KH * KW
    C_pad = _round_up(C_out, LANE)          # lane-dense channel dim

    # --- im2col (plain-JAX glue); row order (n, oh, ow), col order (c, kh, kw)
    #     to match PyTorch's weight.reshape(C_out, C_in*4*4).
    xp = jnp.pad(x, ((0, 0), (0, 0), (PAD, PAD), (PAD, PAD)))
    cols = []
    for kh in range(KH):
        for kw in range(KW):
            cols.append(xp[:, :, kh:kh + STRIDE * H_out:STRIDE,
                              kw:kw + STRIDE * W_out:STRIDE])
    patches = jnp.stack(cols, axis=2)              # (N, C_in, 16, H_out, W_out)
    patches = patches.transpose(0, 3, 4, 1, 2)     # (N, H_out, W_out, C_in, 16)
    P = patches.reshape(M, K).astype(jnp.bfloat16)

    Wm = weight.reshape(C_out, K).T.astype(jnp.bfloat16)     # (K, C_out)
    Wm = jnp.pad(Wm, ((0, 0), (0, C_pad - C_out)))           # (K, C_pad), zero cols

    # --- M tiling: multiple of 128 rows, capped so the bf16 P tile stays small
    #     enough for double-buffering on every generation (incl. v7x 64 MiB VMEM).
    max_tm_for_vmem = max(LANE, ((4 * 1024 * 1024) // (K * 2)) // LANE * LANE)
    TM = min(block_m, max_tm_for_vmem, _round_up(M, LANE))
    n_tiles = -(-M // TM)
    M_pad = n_tiles * TM
    if M_pad != M:
        # zero rows: contribute 0 to sum/sumsq, mean/var divide by real M below.
        P = jnp.pad(P, ((0, M_pad - M), (0, 0)))

    vmem_limit = 32 * 1024 * 1024

    # ---------------- pass 1: conv + streaming stats ----------------
    conv, stats = pl.pallas_call(
        _conv_stats_kernel,
        out_shape=(jax.ShapeDtypeStruct((M_pad, C_pad), jnp.float32),
                   jax.ShapeDtypeStruct((8, C_pad), jnp.float32)),
        grid=(n_tiles,),
        in_specs=[
            pl.BlockSpec((TM, K), lambda i: (i, 0)),
            pl.BlockSpec((K, C_pad), lambda i: (0, 0)),
        ],
        out_specs=(
            pl.BlockSpec((TM, C_pad), lambda i: (i, 0)),
            pl.BlockSpec((8, C_pad), lambda i: (0, 0)),
        ),
        compiler_params=pltpu.CompilerParams(
            dimension_semantics=("arbitrary",),   # stats accumulation across tiles
            vmem_limit_bytes=vmem_limit),
        cost_estimate=pl.CostEstimate(
            flops=2 * M_pad * K * C_pad,
            transcendentals=0,
            bytes_accessed=(M_pad * K * 2 + K * C_pad * 2
                            + M_pad * C_pad * 4 + 8 * C_pad * 4)),
    )(P, Wm)

    # --- finalize BN (tiny, plain JAX): fold gamma/beta into scale/shift once.
    inv_m = 1.0 / float(M)
    mean = stats[0] * inv_m
    var = jnp.maximum(stats[1] * inv_m - mean * mean, 0.0)
    g = jnp.pad(gamma.astype(jnp.float32), (0, C_pad - C_out))
    b = jnp.pad(beta.astype(jnp.float32), (0, C_pad - C_out))
    scale = g * jax.lax.rsqrt(var + EPS)
    shift = b - mean * scale
    scale = scale.reshape(1, C_pad)
    shift = shift.reshape(1, C_pad)

    # ---------------- pass 2: normalize + LeakyReLU (parallel over M) -------
    out = pl.pallas_call(
        _bn_lrelu_kernel,
        out_shape=jax.ShapeDtypeStruct((M_pad, C_pad), jnp.float32),
        grid=(n_tiles,),
        in_specs=[
            pl.BlockSpec((TM, C_pad), lambda i: (i, 0)),
            pl.BlockSpec((1, C_pad), lambda i: (0, 0)),
            pl.BlockSpec((1, C_pad), lambda i: (0, 0)),
        ],
        out_specs=pl.BlockSpec((TM, C_pad), lambda i: (i, 0)),
        compiler_params=pltpu.CompilerParams(
            dimension_semantics=("parallel",),
            vmem_limit_bytes=vmem_limit),
        cost_estimate=pl.CostEstimate(
            flops=2 * M_pad * C_pad,
            transcendentals=0,
            bytes_accessed=2 * M_pad * C_pad * 4 + 2 * C_pad * 4),
    )(conv, scale, shift)

    # drop M / channel padding, back to NCHW
    out = out[:M, :C_out]
    return out.reshape(N, H_out, W_out, C_out).transpose(0, 3, 1, 2)


def _reference(x, weight, gamma, beta):
    """Pure-JAX f32 reference replicating the PyTorch module (training-mode BN)."""
    conv = jax.lax.conv_general_dilated(
        x, weight, window_strides=(STRIDE, STRIDE),
        padding=((PAD, PAD), (PAD, PAD)),
        dimension_numbers=("NCHW", "OIHW", "NCHW"))
    mean = jnp.mean(conv, axis=(0, 2, 3), keepdims=True)
    var = jnp.mean((conv - mean) ** 2, axis=(0, 2, 3), keepdims=True)
    y = (conv - mean) * jax.lax.rsqrt(var + EPS)
    y = y * gamma.reshape(1, -1, 1, 1) + beta.reshape(1, -1, 1, 1)
    return jnp.where(y >= 0, y, NEG_SLOPE * y)


if __name__ == "__main__":
    # Small deterministic setup: in_channel=4 -> out_channel=8, input 2x4x16x16.
    key = jax.random.PRNGKey(0)
    k_x, k_w = jax.random.split(key)

    N, C_in, H, W = 2, 4, 16, 16
    C_out = 2 * C_in

    x = jax.random.normal(k_x, (N, C_in, H, W), dtype=jnp.float32)
    fan_in = C_in * KH * KW
    weight = jax.random.normal(k_w, (C_out, C_in, KH, KW),
                               dtype=jnp.float32) / jnp.sqrt(fan_in)
    # BatchNorm affine params at PyTorch defaults (running stats not updated;
    # forward uses batch statistics as in training mode).
    gamma = jnp.ones((C_out,), dtype=jnp.float32)
    beta = jnp.zeros((C_out,), dtype=jnp.float32)

    out = jax.block_until_ready(downsample_block(x, weight, gamma, beta))
    ref = jax.block_until_ready(_reference(x, weight, gamma, beta))

    assert out.shape == (N, C_out, H // 2, W // 2), out.shape
    # bf16 MXU operands (f32 accumulation) -> slightly looser tolerance vs f32 ref.
    if not jnp.allclose(out, ref, atol=2e-2, rtol=2e-2):
        raise AssertionError("Pallas kernel does not match reference")

    print("KERNEL_OK")
</pallas_src>

<mosaic_0001>
module attributes {stable_mosaic.version = 11 : i64} {
  func.func @_conv_stats_kernel(%arg0: i32, %arg1: memref<128x64xbf16, #tpu.memory_space<vmem>>, %arg2: memref<64x128xbf16, #tpu.memory_space<vmem>>, %arg3: memref<128x128xf32, #tpu.memory_space<vmem>>, %arg4: memref<8x128xf32, #tpu.memory_space<vmem>>) attributes {dimension_semantics = [#tpu.dimension_semantics<arbitrary>], iteration_bounds = array<i64: 1>, scalar_prefetch = 0 : i64, scratch_operands = 0 : i64, tpu.core_type = #tpu.core_type<tc>, window_params = [{transform_indices = @transform_0, window_bounds = array<i64: 128, 64>}, {pipeline_mode = #tpu.pipeline_mode<synchronous>, transform_indices = @transform_1, window_bounds = array<i64: 64, 128>}, {transform_indices = @transform_2, window_bounds = array<i64: 128, 128>}, {pipeline_mode = #tpu.pipeline_mode<synchronous>, transform_indices = @transform_3, window_bounds = array<i64: 8, 128>}]} {
    %c0 = arith.constant 0 : index
    %c0_0 = arith.constant 0 : index
    %0 = vector.load %arg1[%c0, %c0_0] : memref<128x64xbf16, #tpu.memory_space<vmem>>, vector<128x64xbf16>
    %c0_1 = arith.constant 0 : index
    %c0_2 = arith.constant 0 : index
    %1 = vector.load %arg2[%c0_1, %c0_2] : memref<64x128xbf16, #tpu.memory_space<vmem>>, vector<64x128xbf16>
    %cst = arith.constant dense<0.000000e+00> : vector<128x128xf32>
    %2 = tpu.matmul %0, %1, %cst {dimension_numbers = #tpu.dot_dimension_numbers<[1], [0], [0], [1], [0, 0, 1, 1], [], []>} : vector<128x64xbf16>, vector<64x128xbf16>, vector<128x128xf32> -> vector<128x128xf32>
    %c0_3 = arith.constant 0 : index
    %c0_4 = arith.constant 0 : index
    %3 = vector.load %arg3[%c0_3, %c0_4] : memref<128x128xf32, #tpu.memory_space<vmem>>, vector<128x128xf32>
    tpu.vector_store %arg3[%c0_3, %c0_4], %2 {strides = array<i32>} : memref<128x128xf32, #tpu.memory_space<vmem>>, vector<128x128xf32>,
    %c0_i32 = arith.constant 0 : i32
    %4 = arith.cmpi eq, %arg0, %c0_i32 : i32
    %5 = arith.extui %4 : i1 to i32
    %c0_i32_5 = arith.constant 0 : i32
    %6 = arith.cmpi ne, %5, %c0_i32_5 : i32
    scf.if %6 {
      %cst_15 = arith.constant 0.000000e+00 : f32
      %18 = vector.broadcast %cst_15 : f32 to vector<8x128xf32>
      %c0_16 = arith.constant 0 : index
      %c0_17 = arith.constant 0 : index
      %19 = vector.load %arg4[%c0_16, %c0_17] : memref<8x128xf32, #tpu.memory_space<vmem>>, vector<8x128xf32>
      tpu.vector_store %arg4[%c0_16, %c0_17], %18 {strides = array<i32>} : memref<8x128xf32, #tpu.memory_space<vmem>>, vector<8x128xf32>,
    } else {
    }
    %c0_6 = arith.constant 0 : index
    %c0_7 = arith.constant 0 : index
    %7 = vector.load %arg4[%c0_6, %c0_7] : memref<8x128xf32, #tpu.memory_space<vmem>>, vector<1x128xf32>
    %cst_8 = arith.constant dense<0.000000e+00> : vector<128xf32>
    %8 = vector.multi_reduction <add>, %2, %cst_8 [0] : vector<128x128xf32> to vector<128xf32>
    %9 = vector.shape_cast %8 : vector<128xf32> to vector<1x128xf32>
    %10 = arith.addf %7, %9 : vector<1x128xf32>
    %c0_9 = arith.constant 0 : index
    %c0_10 = arith.constant 0 : index
    %11 = vector.load %arg4[%c0_9, %c0_10] : memref<8x128xf32, #tpu.memory_space<vmem>>, vector<1x128xf32>
    tpu.vector_store %arg4[%c0_9, %c0_10], %10 {strides = array<i32>} : memref<8x128xf32, #tpu.memory_space<vmem>>, vector<1x128xf32>,
    %c1 = arith.constant 1 : index
    %c0_11 = arith.constant 0 : index
    %12 = vector.load %arg4[%c1, %c0_11] : memref<8x128xf32, #tpu.memory_space<vmem>>, vector<1x128xf32>
    %13 = arith.mulf %2, %2 : vector<128x128xf32>
    %cst_12 = arith.constant dense<0.000000e+00> : vector<128xf32>
    %14 = vector.multi_reduction <add>, %13, %cst_12 [0] : vector<128x128xf32> to vector<128xf32>
    %15 = vector.shape_cast %14 : vector<128xf32> to vector<1x128xf32>
    %16 = arith.addf %12, %15 : vector<1x128xf32>
    %c1_13 = arith.constant 1 : index
    %c0_14 = arith.constant 0 : index
    %17 = vector.load %arg4[%c1_13, %c0_14] : memref<8x128xf32, #tpu.memory_space<vmem>>, vector<1x128xf32>
    tpu.vector_store %arg4[%c1_13, %c0_14], %16 {strides = array<i32>} : memref<8x128xf32, #tpu.memory_space<vmem>>, vector<1x128xf32>,
    return
  }
  func.func @transform_0(%arg0: i32) -> (i32, i32) {
    %c0_i32 = arith.constant 0 : i32
    %c0_i32_0 = arith.constant 0 : i32
    return %arg0, %c0_i32 : i32, i32
  }
  func.func @transform_1(%arg0: i32) -> (i32, i32) {
    %c0_i32 = arith.constant 0 : i32
    %c0_i32_0 = arith.constant 0 : i32
    %c0_i32_1 = arith.constant 0 : i32
    return %c0_i32, %c0_i32_0 : i32, i32
  }
  func.func @transform_2(%arg0: i32) -> (i32, i32) {
    %c0_i32 = arith.constant 0 : i32
    %c0_i32_0 = arith.constant 0 : i32
    return %arg0, %c0_i32 : i32, i32
  }
  func.func @transform_3(%arg0: i32) -> (i32, i32) {
    %c0_i32 = arith.constant 0 : i32
    %c0_i32_0 = arith.constant 0 : i32
    %c0_i32_1 = arith.constant 0 : i32
    return %c0_i32, %c0_i32_0 : i32, i32
  }
}

</mosaic_0001>

<bundles_post_ra>
// kernel: tpu_custom_call.1
= control target key start
LH: loop header
LB: loop body
LE: loop exit
PB: predicated region body
PF: predicated region fallthrough
CT: control target
= control target key end

     0   :  { %9 = vsyncpa [#allocation3], 0  ;;  %vm104_vm0 = vcmask 523264   ;;  %s565_s0 = inlined_call_operand.vmem [shape: bf16[128,64], index: 0, kind: input, shape index: {}]   ;;  %s566_s1 = inlined_call_operand.vmem [shape: bf16[64,128], index: 1, kind: input, shape index: {}]   ;;  %s567_s2 = inlined_call_operand.hbm [shape: f32[128,128], index: 2, kind: output, shape index: {0}]   ;;  %s568_s3 = inlined_call_operand.hbm [shape: f32[8,128], index: 3, kind: output, shape index: {1}]  }
   0x1   :  { %v410_v0 = vld [vmem:[%s566_s1 + $0x18] sm:$0xff]   ;;  %v411_v1 = vld [vmem:[%s566_s1 + $0x10] sm:$0xff]   ;;  %v412_v2 = vld [vmem:[%s566_s1 + $0x8] sm:$0xff]  }
   0x2   :  { %373 = vmatprep.subr.bf16.mxu0 %v410_v0  ;;  %397 = vmatprep.subr.bf16.mxu1 %v410_v0  ;;  %v414_v3 = vld [vmem:[%s565_s0] sm:$0xff]  }
   0x3   :  { %374 = vmatpush3.bf16.msra.mxu0 %v410_v0  ;;  %401 = vmatpush3.bf16.msra.mxu1 %v410_v0  ;;  %v413_v4 = vld [vmem:[%s566_s1] sm:$0xff]  }
   0x4   :  { %375 = vmatprep.subr.bf16.mxu0 %v411_v1  ;;  %398 = vmatprep.subr.bf16.mxu1 %v411_v1  ;;  %v418_v5 = vld [vmem:[%s565_s0 + $0x20] sm:$0xff]  }
   0x5   :  { %381 = vmatprep.mubr.msk.bf16.mxu0 %vm104_vm0, %v414_v3  ;;  %389 = vmatprep.mubr.msk.bf16.mxu1 %vm104_vm0, %v418_v5 }
   0x7   :  { %376 = vmatpush3.bf16.msra.mxu0 %v411_v1  ;;  %402 = vmatpush3.bf16.msra.mxu1 %v411_v1 }
   0x8   :  { %377 = vmatprep.subr.bf16.mxu0 %v412_v2  ;;  %399 = vmatprep.subr.bf16.mxu1 %v412_v2 }
   0xb   :  { %378 = vmatpush3.bf16.msra.mxu0 %v412_v2  ;;  %403 = vmatpush3.bf16.msra.mxu1 %v412_v2 }
   0xc   :  { %379 = vmatprep.subr.bf16.mxu0 %v413_v4  ;;  %400 = vmatprep.subr.bf16.mxu1 %v413_v4 }
   0xd   :  { %10 = vsyncpa [#allocation5], 0  ;;  %v415_v6 = vld [vmem:[%s565_s0 + $0x8] sm:$0xff]   ;;  %v416_v8 = vld [vmem:[%s565_s0 + $0x10] sm:$0xff]   ;;  %v466_v12 = vmov 0.0  }
   0xe   :  { %v419_v7 = vld [vmem:[%s565_s0 + $0x28] sm:$0xff]   ;;  %v420_v9 = vld [vmem:[%s565_s0 + $0x30] sm:$0xff]   ;;  %v417_v10 = vld [vmem:[%s565_s0 + $0x18] sm:$0xff]   ;;  %246 = vst [vmem:[#allocation4] sm:$0xff] %v466_v12 }
   0xf   :  { %380 = vmatpush3.bf16.msra.mxu0 %v413_v4  ;;  %404 = vmatpush3.bf16.msra.mxu1 %v413_v4  ;;  %v421_v11 = vld [vmem:[%s565_s0 + $0x38] sm:$0xff]   ;;  %s467_s0 = smov [#allocation2]  }
  0x10   :  { %s316_s8 = sshll.u32 %s467_s0, 4  ;;  %s317_s8 = int_to_ptr.vmem [resolvable:$true] %s316_s8 }
  0x11   :  { %s422_s9 = scalar_lea.vmem %s317_s8, 2048  ;;  %p427_p1 = scmp.lt.s32.totalorder %s317_s8, %s317_s8 }
  0x12   :  { %382 = vmatmul.mubr.msk.bf16.vlgmr.msra.gmra.mxu0 %vm104_vm0, %v415_v6  ;;  %390 = vmatmul.mubr.msk.bf16.vlgmr.msra.gmra.mxu1 %vm104_vm0, %v419_v7  ;;  %p423_p0 = scmp.ne.s32.totalorder %s317_s8, %s422_s9  ;;  %p428_p2 = scmp.lt.s32.totalorder %s422_s9, %s422_s9 }
  0x13   :  { %385 = vmatprep.mubr.msk.bf16.mxu0 %vm104_vm0, %v416_v8  ;;  %393 = vmatprep.mubr.msk.bf16.mxu1 %vm104_vm0, %v420_v9 }
  0x14   :  { %p429_p3 = por %p428_p2, %p427_p1 }
  0x16   :  { %p430_p4 = pnand %p429_p3, %p423_p0 }
  0x1a   :  { %386 = vmatmul.mubr.msk.bf16.gmra.mxu0 %vm104_vm0, %v417_v10  ;;  %394 = vmatmul.mubr.msk.bf16.gmra.mxu1 %vm104_vm0, %v421_v11 }
  0xd2   :  { %v383_v13 = vpop.f32.mrf.mxu0  ;;  %v535_v14 = vpop.f32.mrf.mxu1 }
  0xd3   :  { %228 = vst [vmem:[#allocation2 + $0x10] sm:$0xff] %v383_v13  ;;  %236 = vst [vmem:[#allocation2 + $0x50] sm:$0xff] %v535_v14  ;;  %v274_v26 = vmul.f32 %v383_v13, %v383_v13 }
  0xd4   :  { %v163_v15 = vpop.f32.mrf.mxu0  ;;  %v538_v16 = vpop.f32.mrf.mxu1 }
  0xd5   :  { %226 = vst [vmem:[#allocation2] sm:$0xff] %v163_v15  ;;  %234 = vst [vmem:[#allocation2 + $0x40] sm:$0xff] %v538_v16  ;;  %v272_v21 = vmul.f32 %v163_v15, %v163_v15 }
  0xd6   :  { %v384_v17 = vpop.f32.mrf.mxu0  ;;  %v541_v18 = vpop.f32.mrf.mxu1 }
  0xd7   :  { %229 = vst [vmem:[#allocation2 + $0x18] sm:$0xff] %v384_v17  ;;  %237 = vst [vmem:[#allocation2 + $0x58] sm:$0xff] %v541_v18  ;;  %v275_v31 = vmul.f32 %v384_v17, %v384_v17 }
  0xd8   :  { %v166_v19 = vpop.f32.mrf.mxu0  ;;  %v198_v20 = vpop.f32.mrf.mxu1 }
  0xd9   :  { %227 = vst [vmem:[#allocation2 + $0x8] sm:$0xff] %v166_v19  ;;  %v248_v22 = vadd.f32 %v166_v19, %v163_v15  ;;  %v273_v23 = vmul.f32 %v166_v19, %v166_v19  ;;  %235 = vst [vmem:[#allocation2 + $0x48] sm:$0xff] %v198_v20 }
  0xda   :  { %v387_v24 = vpop.f32.mrf.mxu0  ;;  %v544_v25 = vpop.f32.mrf.mxu1 }
  0xdb   :  { %v249_v27 = vadd.f32 %v383_v13, %v248_v22  ;;  %v288_v28 = vadd.f32 %v273_v23, %v272_v21  ;;  %232 = vst [vmem:[#allocation2 + $0x30] sm:$0xff] %v387_v24  ;;  %240 = vst [vmem:[#allocation2 + $0x70] sm:$0xff] %v544_v25 }
  0xdc   :  { %v179_v29 = vpop.f32.mrf.mxu0  ;;  %v211_v30 = vpop.f32.mrf.mxu1 }
  0xdd   :  { %v289_v32 = vadd.f32 %v288_v28, %v274_v26  ;;  %230 = vst [vmem:[#allocation2 + $0x20] sm:$0xff] %v179_v29  ;;  %v250_v33 = vadd.f32 %v384_v17, %v249_v27  ;;  %238 = vst [vmem:[#allocation2 + $0x60] sm:$0xff] %v211_v30  ;;  %v276_v37 = vmul.f32 %v179_v29, %v179_v29 }
  0xde   :  { %v388_v34 = vpop.f32.mrf.mxu0  ;;  %v396_v35 = vpop.f32.mrf.mxu1 }
  0xdf   :  { %v251_v36 = vadd.f32 %v250_v33, %v179_v29  ;;  %v290_v38 = vadd.f32 %v289_v32, %v275_v31  ;;  %233 = vst [vmem:[#allocation2 + $0x38] sm:$0xff] %v388_v34  ;;  %241 = vst [vmem:[#allocation2 + $0x78] sm:$0xff] %v396_v35 }
  0xe0   :  { %v182_v39 = vpop.f32.mrf.mxu0  ;;  %v214_v40 = vpop.f32.mrf.mxu1 }
  0xe1   :  { %v291_v41 = vadd.f32 %v290_v38, %v276_v37  ;;  %231 = vst [vmem:[#allocation2 + $0x28] sm:$0xff] %v182_v39  ;;  %v252_v42 = vadd.f32 %v251_v36, %v182_v39  ;;  %v277_v43 = vmul.f32 %v182_v39, %v182_v39  ;;  %239 = vst [vmem:[#allocation2 + $0x68] sm:$0xff] %v214_v40 }
  0xe2   :  { %433 = shalt.err (!%p430_p4)
}
  0xe3   :  { %s468_s10 = smov 128   ;;  %s469_s11 = smov 8   ;;  %v278_v44 = vmul.f32 %v387_v24, %v387_v24  ;;  %v253_v45 = vadd.f32 %v387_v24, %v252_v42  ;;  %v292_v46 = vadd.f32 %v291_v41, %v277_v43  ;;  %v279_v47 = vmul.f32 %v388_v34, %v388_v34  ;;  %v271_v23 = vld [vmem:[#allocation4 + $0x1] sm:$0x1] }
  0xe4   :  { %322 = dma.vmem_to_hbm [thread:$0]  %s317_s8, 2048, %s567_s2, [#allocation3], %s468_s10, %s468_s10, %s469_s11   ;;  %v280_v50 = vmul.f32 %v538_v16, %v538_v16  ;;  %v281_v54 = vmul.f32 %v198_v20, %v198_v20  ;;  %v282_v56 = vmul.f32 %v535_v14, %v535_v14  ;;  %v283_v59 = vmul.f32 %v541_v18, %v541_v18 }
  0xe5   :  { %v254_v48 = vadd.f32 %v388_v34, %v253_v45  ;;  %v293_v49 = vadd.f32 %v292_v46, %v278_v44  ;;  %v284_v63 = vmul.f32 %v211_v30, %v211_v30  ;;  %v285_v3 = vmul.f32 %v214_v40, %v214_v40  ;;  %s470_s2 = smov [#allocation4]  }
  0xe6   :  { %v286_v4 = vmul.f32 %v544_v25, %v544_v25  ;;  %v287_v7 = vmul.f32 %v396_v35, %v396_v35  ;;  %s329_s14 = sshll.u32 %s470_s2, 4  ;;  %s330_s14 = int_to_ptr.vmem [resolvable:$true] %s329_s14 }
  0xe7   :  { %v294_v51 = vadd.f32 %v293_v49, %v279_v47  ;;  %v255_v52 = vadd.f32 %v254_v48, %v538_v16  ;;  %s442_s15 = scalar_lea.vmem %s330_s14, 128  ;;  %p447_p6 = scmp.lt.s32.totalorder %s330_s14, %s330_s14 }
  0xe8   :  { %p443_p5 = scmp.ne.s32.totalorder %s330_s14, %s442_s15  ;;  %p448_p7 = scmp.lt.s32.totalorder %s442_s15, %s442_s15 }
  0xe9   :  { %v256_v53 = vadd.f32 %v255_v52, %v198_v20  ;;  %v295_v55 = vadd.f32 %v294_v51, %v280_v50  ;;  %v247_v20 = vld [vmem:[#allocation4] sm:$0x1] }
  0xea   :  { %p449_p8 = por %p448_p7, %p447_p6 }
  0xeb   :  { %v257_v57 = vadd.f32 %v535_v14, %v256_v53  ;;  %v296_v58 = vadd.f32 %v295_v55, %v281_v54 }
  0xec   :  { %p450_p9 = pnand %p449_p8, %p443_p5 }
  0xed   :  { %v297_v60 = vadd.f32 %v296_v58, %v282_v56  ;;  %v258_v61 = vadd.f32 %v541_v18, %v257_v57 }
  0xef   :  { %v259_v62 = vadd.f32 %v258_v61, %v211_v30  ;;  %v298_v0 = vadd.f32 %v297_v60, %v283_v59 }
  0xf1   :  { %v299_v1 = vadd.f32 %v298_v0, %v284_v63  ;;  %v260_v2 = vadd.f32 %v259_v62, %v214_v40 }
  0xf3   :  { %v261_v5 = vadd.f32 %v544_v25, %v260_v2  ;;  %v300_v6 = vadd.f32 %v299_v1, %v285_v3 }
  0xf5   :  { %v262_v8 = vadd.f32 %v396_v35, %v261_v5  ;;  %v301_v9 = vadd.f32 %v300_v6, %v286_v4 }
  0xf7   :  { %v263_v10 = vrot.slane %v262_v8, 4  ;;  %v302_v11 = vadd.f32 %v301_v9, %v287_v7 }
  0xf9   :  { %v264_v12 = vadd.f32 %v263_v10, %v262_v8  ;;  %v303_v13 = vrot.slane %v302_v11, 4 }
  0xfb   :  { %v265_v14 = vrot.slane %v264_v12, 2  ;;  %v304_v15 = vadd.f32 %v303_v13, %v302_v11 }
  0xfd   :  { %v266_v16 = vadd.f32 %v265_v14, %v264_v12  ;;  %v305_v17 = vrot.slane %v304_v15, 2 }
  0xff   :  { %v267_v18 = vrot.slane %v266_v16, 1  ;;  %v306_v19 = vadd.f32 %v305_v17, %v304_v15 }
 0x101   :  { %v268_v21 = vadd.f32 %v267_v18, %v266_v16  ;;  %v307_v22 = vrot.slane %v306_v19, 1 }
 0x103   :  { %v269_v24 = vadd.f32 %v268_v21, %v247_v20  ;;  %v308_v25 = vadd.f32 %v307_v22, %v306_v19 }
 0x105   :  { %270 = vst [vmem:[#allocation4] sm:$0x1] %v269_v24  ;;  %v309_v26 = vadd.f32 %v308_v25, %v271_v23 }
 0x107   :  { %310 = vst [vmem:[#allocation4 + $0x1] sm:$0x1] %v309_v26 }
 0x108   :  { %453 = shalt.err (!%p450_p9)
}
 0x109   :  { %332 = dma.vmem_to_hbm [thread:$0]  %s330_s14, 128, %s568_s3, [#allocation5]  }
 0x10a   :  { %462 = dma.done.wait [#allocation3], 2048  }
 0x10b   :  { %463 = vsyncadd [#allocation3], 4294965248 }
 0x10c   :  { %464 = dma.done.wait [#allocation5], 128  }
 0x10d   :  { %465 = vsyncadd [#allocation5], 4294967168 }
 0x10e   :  { %339 = vsyncpa [#allocation3], 1 }
 0x10f   :  { %340 = vsyncpa [#allocation5], 1 }

</bundles_post_ra>
